<compile_context>
chip_gen: v6e
topology: v6e:2x2x1
jax: 0.10.0
libtpu: 0.0.40
codegen_flags: <defaults>
</compile_context>

<pallas_src>
import jax
import jax.numpy as jnp
import numpy as np
from jax.experimental import pallas as pl
from jax.experimental.pallas import tpu as pltpu

INPUT_SIZE = 46
HIDDEN_SIZE = 64
NUM_CLASSES = 8


def _lstm_kernel(
    x_ref,       # (T*Bb, Dp)  this block's timesteps, time-major & flattened
    wx_ref,      # (Dp, 4H)    fused input->gate weights (gate order i, f, g, o)
    wh_ref,      # (H, 4H)     fused hidden->gate weights
    b_ref,       # (1, 4H)     b_ih + b_hh
    wfc_ref,     # (H, C)
    bfc_ref,     # (1, C)
    out_ref,     # (Bb, C)
    gates_sc,    # VMEM (T*Bb, 4H)  input-projection pre-activations
):
    H = wh_ref.shape[0]
    Bb = out_ref.shape[0]
    T = x_ref.shape[0] // Bb

    # Input projection for ALL timesteps of this block in one MXU matmul (h-independent,
    # hoisted off the serial critical path). Bias folded in once here.
    gates_sc[...] = (
        jnp.dot(x_ref[...], wx_ref[...], preferred_element_type=jnp.float32)
        + b_ref[...]
    )

    # Static lane masks, hoisted out of the loop (broadcasts are not CSE'd by JAX).
    # Columns [2H, 3H) are the tanh (g) gate; the rest are sigmoid.
    lane = jax.lax.broadcasted_iota(jnp.int32, (Bb, 4 * H), 1)
    is_tanh = (lane >= 2 * H) & (lane < 3 * H)
    # sigmoid(x) = 0.5*(1 + tanh(x/2)); scale the sigmoid lanes by 0.5 so a single tanh
    # pass covers all four gates.
    scale = jnp.where(is_tanh, jnp.float32(1.0), jnp.float32(0.5))

    h0 = jnp.zeros((Bb, H), jnp.float32)
    c0 = jnp.zeros((Bb, H), jnp.float32)

    def step(t, carry):
        h_prev, c_prev = carry
        start = pl.multiple_of(t * Bb, 8)
        # Only the hidden->gate matmul remains on the recurrence.
        z = gates_sc[pl.ds(start, Bb), :] + jnp.dot(
            h_prev, wh_ref[...], preferred_element_type=jnp.float32
        )
        # One tanh pass over the full (Bb, 4H) tile; sigmoid lanes fixed up with cheap
        # VALU ops (0.5*t + 0.5).
        th = jnp.tanh(z * scale)
        act = jnp.where(is_tanh, th, 0.5 * th + 0.5)
        i_g = act[:, 0 * H:1 * H]
        f_g = act[:, 1 * H:2 * H]
        g_g = act[:, 2 * H:3 * H]
        o_g = act[:, 3 * H:4 * H]
        c_new = f_g * c_prev + i_g * g_g
        h_new = o_g * jnp.tanh(c_new)
        return (h_new, c_new)

    # h/c live in vregs as loop carries (no VMEM round-trip on the serial path).
    h_last, _ = jax.lax.fori_loop(0, T, step, (h0, c0), unroll=True)

    # Final classifier + stable softmax on the last hidden state.
    logits = (
        jnp.dot(h_last, wfc_ref[...], preferred_element_type=jnp.float32)
        + bfc_ref[...]
    )
    m = jnp.max(logits, axis=-1, keepdims=True)
    e = jnp.exp(logits - m)
    inv = pl.reciprocal(jnp.sum(e, axis=-1, keepdims=True), approx=False)
    out_ref[...] = e * inv


def lstm_forward(x, params):
    """x: (B, T, D) float32 -> (B, NUM_CLASSES) float32 softmax probabilities."""
    B, T, D = x.shape
    H, C = HIDDEN_SIZE, NUM_CLASSES
    w_ih, w_hh, b_ih, b_hh, w_fc, b_fc = params

    # PyTorch packs gates along rows as [i | f | g | o]; transpose so the 4H axis becomes
    # the lane (output) axis of one fused matmul per operand. Pad D to a multiple of 8.
    Dp = ((D + 7) // 8) * 8
    wx = jnp.pad(w_ih.T, ((0, Dp - D), (0, 0)))  # (Dp, 4H)
    wh = w_hh.T                                  # (H, 4H)
    b = (b_ih + b_hh).reshape(1, 4 * H)          # (1, 4H)
    wfc = w_fc.T                                 # (H, C)
    bfc = b_fc.reshape(1, C)                     # (1, C)

    # Pad batch to 8-sublane granularity. When the padded batch reaches 16 rows, split it
    # into 2 blocks over a "parallel" grid axis so both v7x TensorCores are used
    # (nb=1 at small batch; no effect on v5e/v6e which have a single TC).
    if B > 8:
        Bp = ((B + 15) // 16) * 16
        nb = 2
    else:
        Bp = 8
        nb = 1
    Bb = Bp // nb

    # Layout: (nb, T, Bb, Dp) flattened to (nb*T*Bb, Dp) so each block's rows are a
    # contiguous, time-major slab and the kernel needs no in-kernel reshapes.
    xp = jnp.pad(x, ((0, Bp - B), (0, 0), (0, Dp - D)))   # (Bp, T, Dp)
    xp = xp.reshape(nb, Bb, T, Dp).transpose(0, 2, 1, 3)  # (nb, T, Bb, Dp)
    x_flat = xp.reshape(nb * T * Bb, Dp)                  # (nb*T*Bb, Dp)

    out = pl.pallas_call(
        _lstm_kernel,
        out_shape=jax.ShapeDtypeStruct((Bp, C), jnp.float32),
        grid_spec=pltpu.PrefetchScalarGridSpec(
            num_scalar_prefetch=0,
            grid=(nb,),
            in_specs=[
                pl.BlockSpec((T * Bb, Dp), lambda i: (i, 0)),   # per-block x slab
                pl.BlockSpec(wx.shape, lambda i: (0, 0)),
                pl.BlockSpec(wh.shape, lambda i: (0, 0)),
                pl.BlockSpec(b.shape, lambda i: (0, 0)),
                pl.BlockSpec(wfc.shape, lambda i: (0, 0)),
                pl.BlockSpec(bfc.shape, lambda i: (0, 0)),
            ],
            out_specs=pl.BlockSpec((Bb, C), lambda i: (i, 0)),
            scratch_shapes=[
                pltpu.VMEM((T * Bb, 4 * H), jnp.float32),  # gate pre-activations
            ],
        ),
        compiler_params=pltpu.CompilerParams(
            dimension_semantics=("parallel",),
        ),
    )(x_flat, wx, wh, b, wfc, bfc)
    return out[:B]


def init_params(key):
    """Deterministic init matching nn.LSTM / nn.Linear shapes (uniform +-1/sqrt(H))."""
    D, H, C = INPUT_SIZE, HIDDEN_SIZE, NUM_CLASSES
    ks = jax.random.split(key, 6)
    s = 1.0 / np.sqrt(H)
    w_ih = jax.random.uniform(ks[0], (4 * H, D), jnp.float32, -s, s)
    w_hh = jax.random.uniform(ks[1], (4 * H, H), jnp.float32, -s, s)
    b_ih = jax.random.uniform(ks[2], (4 * H,), jnp.float32, -s, s)
    b_hh = jax.random.uniform(ks[3], (4 * H,), jnp.float32, -s, s)
    w_fc = jax.random.uniform(ks[4], (C, H), jnp.float32, -s, s)
    b_fc = jax.random.uniform(ks[5], (C,), jnp.float32, -s, s)
    return (w_ih, w_hh, b_ih, b_hh, w_fc, b_fc)


def reference_forward(x, params):
    """Pure-JAX reference (same math as the PyTorch module) for a correctness check."""
    w_ih, w_hh, b_ih, b_hh, w_fc, b_fc = params
    B, T, D = x.shape
    H = HIDDEN_SIZE

    def step(carry, x_t):
        h, c = carry
        gates = x_t @ w_ih.T + h @ w_hh.T + b_ih + b_hh
        i = jax.nn.sigmoid(gates[:, 0:H])
        f = jax.nn.sigmoid(gates[:, H:2 * H])
        g = jnp.tanh(gates[:, 2 * H:3 * H])
        o = jax.nn.sigmoid(gates[:, 3 * H:4 * H])
        c = f * c + i * g
        h = o * jnp.tanh(c)
        return (h, c), None

    h0 = jnp.zeros((B, H), jnp.float32)
    c0 = jnp.zeros((B, H), jnp.float32)
    (h_last, _), _ = jax.lax.scan(step, (h0, c0), jnp.transpose(x, (1, 0, 2)))
    logits = h_last @ w_fc.T + b_fc
    return jax.nn.softmax(logits, axis=1)


if __name__ == "__main__":
    key = jax.random.PRNGKey(0)
    k_param, k_x = jax.random.split(key)

    B, T = 2, 8
    x = jax.random.normal(k_x, (B, T, INPUT_SIZE), jnp.float32)
    params = init_params(k_param)

    out = jax.block_until_ready(lstm_forward(x, params))
    ref = jax.block_until_ready(reference_forward(x, params))

    np.testing.assert_allclose(np.asarray(out), np.asarray(ref), rtol=1e-5, atol=1e-5)
    assert out.shape == (B, NUM_CLASSES)
    print("KERNEL_OK")
</pallas_src>

<mosaic_0001>
module attributes {stable_mosaic.version = 11 : i64} {
  func.func @_lstm_kernel(%arg0: i32, %arg1: memref<64x48xf32, #tpu.memory_space<vmem>>, %arg2: memref<48x256xf32, #tpu.memory_space<vmem>>, %arg3: memref<64x256xf32, #tpu.memory_space<vmem>>, %arg4: memref<1x256xf32, #tpu.memory_space<vmem>>, %arg5: memref<64x8xf32, #tpu.memory_space<vmem>>, %arg6: memref<1x8xf32, #tpu.memory_space<vmem>>, %arg7: memref<8x8xf32, #tpu.memory_space<vmem>>, %arg8: memref<64x256xf32, #tpu.memory_space<vmem>>) attributes {dimension_semantics = [#tpu.dimension_semantics<parallel>], iteration_bounds = array<i64: 1>, scalar_prefetch = 0 : i64, scratch_operands = 1 : i64, tpu.core_type = #tpu.core_type<tc>, window_params = [{transform_indices = @transform_0, window_bounds = array<i64: 64, 48>}, {pipeline_mode = #tpu.pipeline_mode<synchronous>, transform_indices = @transform_1, window_bounds = array<i64: 48, 256>}, {pipeline_mode = #tpu.pipeline_mode<synchronous>, transform_indices = @transform_2, window_bounds = array<i64: 64, 256>}, {pipeline_mode = #tpu.pipeline_mode<synchronous>, transform_indices = @transform_3, window_bounds = array<i64: 1, 256>}, {pipeline_mode = #tpu.pipeline_mode<synchronous>, transform_indices = @transform_4, window_bounds = array<i64: 64, 8>}, {pipeline_mode = #tpu.pipeline_mode<synchronous>, transform_indices = @transform_5, window_bounds = array<i64: 1, 8>}, {transform_indices = @transform_6, window_bounds = array<i64: 8, 8>}]} {
    %c0 = arith.constant 0 : index
    %c0_0 = arith.constant 0 : index
    %0 = vector.load %arg1[%c0, %c0_0] : memref<64x48xf32, #tpu.memory_space<vmem>>, vector<64x48xf32>
    %c0_1 = arith.constant 0 : index
    %c0_2 = arith.constant 0 : index
    %1 = vector.load %arg2[%c0_1, %c0_2] : memref<48x256xf32, #tpu.memory_space<vmem>>, vector<48x256xf32>
    %cst = arith.constant dense<0.000000e+00> : vector<64x256xf32>
    %2 = tpu.matmul %0, %1, %cst {dimension_numbers = #tpu.dot_dimension_numbers<[1], [0], [0], [1], [0, 0, 1, 1], [], []>} : vector<64x48xf32>, vector<48x256xf32>, vector<64x256xf32> -> vector<64x256xf32>
    %c0_3 = arith.constant 0 : index
    %c0_4 = arith.constant 0 : index
    %3 = vector.load %arg4[%c0_3, %c0_4] : memref<1x256xf32, #tpu.memory_space<vmem>>, vector<1x256xf32>
    %4 = vector.broadcast %3 : vector<1x256xf32> to vector<64x256xf32>
    %5 = arith.addf %2, %4 : vector<64x256xf32>
    %c0_5 = arith.constant 0 : index
    %c0_6 = arith.constant 0 : index
    %6 = vector.load %arg8[%c0_5, %c0_6] : memref<64x256xf32, #tpu.memory_space<vmem>>, vector<64x256xf32>
    tpu.vector_store %arg8[%c0_5, %c0_6], %5 {strides = array<i32>} : memref<64x256xf32, #tpu.memory_space<vmem>>, vector<64x256xf32>,
    %7 = tpu.iota {dimensions = array<i32: 1>} : vector<8x256xi32>
    %c128_i32 = arith.constant 128 : i32
    %8 = vector.broadcast %c128_i32 : i32 to vector<8x256xi32>
    %9 = arith.cmpi sge, %7, %8 : vector<8x256xi32>
    %c192_i32 = arith.constant 192 : i32
    %10 = vector.broadcast %c192_i32 : i32 to vector<8x256xi32>
    %11 = arith.cmpi slt, %7, %10 : vector<8x256xi32>
    %12 = arith.andi %9, %11 : vector<8x256xi1>
    %cst_7 = arith.constant 1.000000e+00 : f32
    %cst_8 = arith.constant 5.000000e-01 : f32
    %13 = vector.broadcast %cst_7 : f32 to vector<8x256xf32>
    %14 = vector.broadcast %cst_8 : f32 to vector<8x256xf32>
    %15 = arith.select %12, %13, %14 : vector<8x256xi1>, vector<8x256xf32>
    %cst_9 = arith.constant 0.000000e+00 : f32
    %16 = vector.broadcast %cst_9 : f32 to vector<8x64xf32>
    %cst_10 = arith.constant 0.000000e+00 : f32
    %17 = vector.broadcast %cst_10 : f32 to vector<8x64xf32>
    %c0_i32 = arith.constant 0 : i32
    %c8_i32 = arith.constant 8 : i32
    %18 = arith.muli %c0_i32, %c8_i32 : i32
    %19 = tpu.assume_multiple %18, 8 : i32
    %20 = arith.index_cast %19 : i32 to index
    %c0_11 = arith.constant 0 : index
    %21 = vector.load %arg8[%20, %c0_11] : memref<64x256xf32, #tpu.memory_space<vmem>>, vector<8x256xf32>
    %c0_12 = arith.constant 0 : index
    %c0_13 = arith.constant 0 : index
    %22 = vector.load %arg3[%c0_12, %c0_13] : memref<64x256xf32, #tpu.memory_space<vmem>>, vector<64x256xf32>
    %cst_14 = arith.constant dense<0.000000e+00> : vector<8x256xf32>
    %23 = tpu.matmul %16, %22, %cst_14 {dimension_numbers = #tpu.dot_dimension_numbers<[1], [0], [0], [1], [0, 0, 1, 1], [], []>} : vector<8x64xf32>, vector<64x256xf32>, vector<8x256xf32> -> vector<8x256xf32>
    %24 = arith.addf %21, %23 : vector<8x256xf32>
    %25 = arith.mulf %24, %15 : vector<8x256xf32>
    %26 = math.tanh %25 : vector<8x256xf32>
    %cst_15 = arith.constant 5.000000e-01 : f32
    %27 = vector.broadcast %cst_15 : f32 to vector<8x256xf32>
    %28 = arith.mulf %27, %26 : vector<8x256xf32>
    %cst_16 = arith.constant 5.000000e-01 : f32
    %29 = vector.broadcast %cst_16 : f32 to vector<8x256xf32>
    %30 = arith.addf %28, %29 : vector<8x256xf32>
    %31 = arith.select %12, %26, %30 : vector<8x256xi1>, vector<8x256xf32>
    %32 = vector.extract_strided_slice %31 {offsets = [0, 0], sizes = [8, 64], strides = [1, 1]} : vector<8x256xf32> to vector<8x64xf32>
    %33 = vector.extract_strided_slice %31 {offsets = [0, 64], sizes = [8, 64], strides = [1, 1]} : vector<8x256xf32> to vector<8x64xf32>
    %34 = vector.extract_strided_slice %31 {offsets = [0, 128], sizes = [8, 64], strides = [1, 1]} : vector<8x256xf32> to vector<8x64xf32>
    %35 = vector.extract_strided_slice %31 {offsets = [0, 192], sizes = [8, 64], strides = [1, 1]} : vector<8x256xf32> to vector<8x64xf32>
    %36 = arith.mulf %33, %17 : vector<8x64xf32>
    %37 = arith.mulf %32, %34 : vector<8x64xf32>
    %38 = arith.addf %36, %37 : vector<8x64xf32>
    %39 = math.tanh %38 : vector<8x64xf32>
    %40 = arith.mulf %35, %39 : vector<8x64xf32>
    %c1_i32 = arith.constant 1 : i32
    %c8_i32_17 = arith.constant 8 : i32
    %41 = arith.muli %c1_i32, %c8_i32_17 : i32
    %42 = tpu.assume_multiple %41, 8 : i32
    %43 = arith.index_cast %42 : i32 to index
    %c0_18 = arith.constant 0 : index
    %44 = vector.load %arg8[%43, %c0_18] : memref<64x256xf32, #tpu.memory_space<vmem>>, vector<8x256xf32>
    %c0_19 = arith.constant 0 : index
    %c0_20 = arith.constant 0 : index
    %45 = vector.load %arg3[%c0_19, %c0_20] : memref<64x256xf32, #tpu.memory_space<vmem>>, vector<64x256xf32>
    %cst_21 = arith.constant dense<0.000000e+00> : vector<8x256xf32>
    %46 = tpu.matmul %40, %45, %cst_21 {dimension_numbers = #tpu.dot_dimension_numbers<[1], [0], [0], [1], [0, 0, 1, 1], [], []>} : vector<8x64xf32>, vector<64x256xf32>, vector<8x256xf32> -> vector<8x256xf32>
    %47 = arith.addf %44, %46 : vector<8x256xf32>
    %48 = arith.mulf %47, %15 : vector<8x256xf32>
    %49 = math.tanh %48 : vector<8x256xf32>
    %cst_22 = arith.constant 5.000000e-01 : f32
    %50 = vector.broadcast %cst_22 : f32 to vector<8x256xf32>
    %51 = arith.mulf %50, %49 : vector<8x256xf32>
    %cst_23 = arith.constant 5.000000e-01 : f32
    %52 = vector.broadcast %cst_23 : f32 to vector<8x256xf32>
    %53 = arith.addf %51, %52 : vector<8x256xf32>
    %54 = arith.select %12, %49, %53 : vector<8x256xi1>, vector<8x256xf32>
    %55 = vector.extract_strided_slice %54 {offsets = [0, 0], sizes = [8, 64], strides = [1, 1]} : vector<8x256xf32> to vector<8x64xf32>
    %56 = vector.extract_strided_slice %54 {offsets = [0, 64], sizes = [8, 64], strides = [1, 1]} : vector<8x256xf32> to vector<8x64xf32>
    %57 = vector.extract_strided_slice %54 {offsets = [0, 128], sizes = [8, 64], strides = [1, 1]} : vector<8x256xf32> to vector<8x64xf32>
    %58 = vector.extract_strided_slice %54 {offsets = [0, 192], sizes = [8, 64], strides = [1, 1]} : vector<8x256xf32> to vector<8x64xf32>
    %59 = arith.mulf %56, %38 : vector<8x64xf32>
    %60 = arith.mulf %55, %57 : vector<8x64xf32>
    %61 = arith.addf %59, %60 : vector<8x64xf32>
    %62 = math.tanh %61 : vector<8x64xf32>
    %63 = arith.mulf %58, %62 : vector<8x64xf32>
    %c2_i32 = arith.constant 2 : i32
    %c8_i32_24 = arith.constant 8 : i32
    %64 = arith.muli %c2_i32, %c8_i32_24 : i32
    %65 = tpu.assume_multiple %64, 8 : i32
    %66 = arith.index_cast %65 : i32 to index
    %c0_25 = arith.constant 0 : index
    %67 = vector.load %arg8[%66, %c0_25] : memref<64x256xf32, #tpu.memory_space<vmem>>, vector<8x256xf32>
    %c0_26 = arith.constant 0 : index
    %c0_27 = arith.constant 0 : index
    %68 = vector.load %arg3[%c0_26, %c0_27] : memref<64x256xf32, #tpu.memory_space<vmem>>, vector<64x256xf32>
    %cst_28 = arith.constant dense<0.000000e+00> : vector<8x256xf32>
    %69 = tpu.matmul %63, %68, %cst_28 {dimension_numbers = #tpu.dot_dimension_numbers<[1], [0], [0], [1], [0, 0, 1, 1], [], []>} : vector<8x64xf32>, vector<64x256xf32>, vector<8x256xf32> -> vector<8x256xf32>
    %70 = arith.addf %67, %69 : vector<8x256xf32>
    %71 = arith.mulf %70, %15 : vector<8x256xf32>
    %72 = math.tanh %71 : vector<8x256xf32>
    %cst_29 = arith.constant 5.000000e-01 : f32
    %73 = vector.broadcast %cst_29 : f32 to vector<8x256xf32>
    %74 = arith.mulf %73, %72 : vector<8x256xf32>
    %cst_30 = arith.constant 5.000000e-01 : f32
    %75 = vector.broadcast %cst_30 : f32 to vector<8x256xf32>
    %76 = arith.addf %74, %75 : vector<8x256xf32>
    %77 = arith.select %12, %72, %76 : vector<8x256xi1>, vector<8x256xf32>
    %78 = vector.extract_strided_slice %77 {offsets = [0, 0], sizes = [8, 64], strides = [1, 1]} : vector<8x256xf32> to vector<8x64xf32>
    %79 = vector.extract_strided_slice %77 {offsets = [0, 64], sizes = [8, 64], strides = [1, 1]} : vector<8x256xf32> to vector<8x64xf32>
    %80 = vector.extract_strided_slice %77 {offsets = [0, 128], sizes = [8, 64], strides = [1, 1]} : vector<8x256xf32> to vector<8x64xf32>
    %81 = vector.extract_strided_slice %77 {offsets = [0, 192], sizes = [8, 64], strides = [1, 1]} : vector<8x256xf32> to vector<8x64xf32>
    %82 = arith.mulf %79, %61 : vector<8x64xf32>
    %83 = arith.mulf %78, %80 : vector<8x64xf32>
    %84 = arith.addf %82, %83 : vector<8x64xf32>
    %85 = math.tanh %84 : vector<8x64xf32>
    %86 = arith.mulf %81, %85 : vector<8x64xf32>
    %c3_i32 = arith.constant 3 : i32
    %c8_i32_31 = arith.constant 8 : i32
    %87 = arith.muli %c3_i32, %c8_i32_31 : i32
    %88 = tpu.assume_multiple %87, 8 : i32
    %89 = arith.index_cast %88 : i32 to index
    %c0_32 = arith.constant 0 : index
    %90 = vector.load %arg8[%89, %c0_32] : memref<64x256xf32, #tpu.memory_space<vmem>>, vector<8x256xf32>
    %c0_33 = arith.constant 0 : index
    %c0_34 = arith.constant 0 : index
    %91 = vector.load %arg3[%c0_33, %c0_34] : memref<64x256xf32, #tpu.memory_space<vmem>>, vector<64x256xf32>
    %cst_35 = arith.constant dense<0.000000e+00> : vector<8x256xf32>
    %92 = tpu.matmul %86, %91, %cst_35 {dimension_numbers = #tpu.dot_dimension_numbers<[1], [0], [0], [1], [0, 0, 1, 1], [], []>} : vector<8x64xf32>, vector<64x256xf32>, vector<8x256xf32> -> vector<8x256xf32>
    %93 = arith.addf %90, %92 : vector<8x256xf32>
    %94 = arith.mulf %93, %15 : vector<8x256xf32>
    %95 = math.tanh %94 : vector<8x256xf32>
    %cst_36 = arith.constant 5.000000e-01 : f32
    %96 = vector.broadcast %cst_36 : f32 to vector<8x256xf32>
    %97 = arith.mulf %96, %95 : vector<8x256xf32>
    %cst_37 = arith.constant 5.000000e-01 : f32
    %98 = vector.broadcast %cst_37 : f32 to vector<8x256xf32>
    %99 = arith.addf %97, %98 : vector<8x256xf32>
    %100 = arith.select %12, %95, %99 : vector<8x256xi1>, vector<8x256xf32>
    %101 = vector.extract_strided_slice %100 {offsets = [0, 0], sizes = [8, 64], strides = [1, 1]} : vector<8x256xf32> to vector<8x64xf32>
    %102 = vector.extract_strided_slice %100 {offsets = [0, 64], sizes = [8, 64], strides = [1, 1]} : vector<8x256xf32> to vector<8x64xf32>
    %103 = vector.extract_strided_slice %100 {offsets = [0, 128], sizes = [8, 64], strides = [1, 1]} : vector<8x256xf32> to vector<8x64xf32>
    %104 = vector.extract_strided_slice %100 {offsets = [0, 192], sizes = [8, 64], strides = [1, 1]} : vector<8x256xf32> to vector<8x64xf32>
    %105 = arith.mulf %102, %84 : vector<8x64xf32>
    %106 = arith.mulf %101, %103 : vector<8x64xf32>
    %107 = arith.addf %105, %106 : vector<8x64xf32>
    %108 = math.tanh %107 : vector<8x64xf32>
    %109 = arith.mulf %104, %108 : vector<8x64xf32>
    %c4_i32 = arith.constant 4 : i32
    %c8_i32_38 = arith.constant 8 : i32
    %110 = arith.muli %c4_i32, %c8_i32_38 : i32
    %111 = tpu.assume_multiple %110, 8 : i32
    %112 = arith.index_cast %111 : i32 to index
    %c0_39 = arith.constant 0 : index
    %113 = vector.load %arg8[%112, %c0_39] : memref<64x256xf32, #tpu.memory_space<vmem>>, vector<8x256xf32>
    %c0_40 = arith.constant 0 : index
    %c0_41 = arith.constant 0 : index
    %114 = vector.load %arg3[%c0_40, %c0_41] : memref<64x256xf32, #tpu.memory_space<vmem>>, vector<64x256xf32>
    %cst_42 = arith.constant dense<0.000000e+00> : vector<8x256xf32>
    %115 = tpu.matmul %109, %114, %cst_42 {dimension_numbers = #tpu.dot_dimension_numbers<[1], [0], [0], [1], [0, 0, 1, 1], [], []>} : vector<8x64xf32>, vector<64x256xf32>, vector<8x256xf32> -> vector<8x256xf32>
    %116 = arith.addf %113, %115 : vector<8x256xf32>
    %117 = arith.mulf %116, %15 : vector<8x256xf32>
    %118 = math.tanh %117 : vector<8x256xf32>
    %cst_43 = arith.constant 5.000000e-01 : f32
    %119 = vector.broadcast %cst_43 : f32 to vector<8x256xf32>
    %120 = arith.mulf %119, %118 : vector<8x256xf32>
    %cst_44 = arith.constant 5.000000e-01 : f32
    %121 = vector.broadcast %cst_44 : f32 to vector<8x256xf32>
    %122 = arith.addf %120, %121 : vector<8x256xf32>
    %123 = arith.select %12, %118, %122 : vector<8x256xi1>, vector<8x256xf32>
    %124 = vector.extract_strided_slice %123 {offsets = [0, 0], sizes = [8, 64], strides = [1, 1]} : vector<8x256xf32> to vector<8x64xf32>
    %125 = vector.extract_strided_slice %123 {offsets = [0, 64], sizes = [8, 64], strides = [1, 1]} : vector<8x256xf32> to vector<8x64xf32>
    %126 = vector.extract_strided_slice %123 {offsets = [0, 128], sizes = [8, 64], strides = [1, 1]} : vector<8x256xf32> to vector<8x64xf32>
    %127 = vector.extract_strided_slice %123 {offsets = [0, 192], sizes = [8, 64], strides = [1, 1]} : vector<8x256xf32> to vector<8x64xf32>
    %128 = arith.mulf %125, %107 : vector<8x64xf32>
    %129 = arith.mulf %124, %126 : vector<8x64xf32>
    %130 = arith.addf %128, %129 : vector<8x64xf32>
    %131 = math.tanh %130 : vector<8x64xf32>
    %132 = arith.mulf %127, %131 : vector<8x64xf32>
    %c5_i32 = arith.constant 5 : i32
    %c8_i32_45 = arith.constant 8 : i32
    %133 = arith.muli %c5_i32, %c8_i32_45 : i32
    %134 = tpu.assume_multiple %133, 8 : i32
    %135 = arith.index_cast %134 : i32 to index
    %c0_46 = arith.constant 0 : index
    %136 = vector.load %arg8[%135, %c0_46] : memref<64x256xf32, #tpu.memory_space<vmem>>, vector<8x256xf32>
    %c0_47 = arith.constant 0 : index
    %c0_48 = arith.constant 0 : index
    %137 = vector.load %arg3[%c0_47, %c0_48] : memref<64x256xf32, #tpu.memory_space<vmem>>, vector<64x256xf32>
    %cst_49 = arith.constant dense<0.000000e+00> : vector<8x256xf32>
    %138 = tpu.matmul %132, %137, %cst_49 {dimension_numbers = #tpu.dot_dimension_numbers<[1], [0], [0], [1], [0, 0, 1, 1], [], []>} : vector<8x64xf32>, vector<64x256xf32>, vector<8x256xf32> -> vector<8x256xf32>
    %139 = arith.addf %136, %138 : vector<8x256xf32>
    %140 = arith.mulf %139, %15 : vector<8x256xf32>
    %141 = math.tanh %140 : vector<8x256xf32>
    %cst_50 = arith.constant 5.000000e-01 : f32
    %142 = vector.broadcast %cst_50 : f32 to vector<8x256xf32>
    %143 = arith.mulf %142, %141 : vector<8x256xf32>
    %cst_51 = arith.constant 5.000000e-01 : f32
    %144 = vector.broadcast %cst_51 : f32 to vector<8x256xf32>
    %145 = arith.addf %143, %144 : vector<8x256xf32>
    %146 = arith.select %12, %141, %145 : vector<8x256xi1>, vector<8x256xf32>
    %147 = vector.extract_strided_slice %146 {offsets = [0, 0], sizes = [8, 64], strides = [1, 1]} : vector<8x256xf32> to vector<8x64xf32>
    %148 = vector.extract_strided_slice %146 {offsets = [0, 64], sizes = [8, 64], strides = [1, 1]} : vector<8x256xf32> to vector<8x64xf32>
    %149 = vector.extract_strided_slice %146 {offsets = [0, 128], sizes = [8, 64], strides = [1, 1]} : vector<8x256xf32> to vector<8x64xf32>
    %150 = vector.extract_strided_slice %146 {offsets = [0, 192], sizes = [8, 64], strides = [1, 1]} : vector<8x256xf32> to vector<8x64xf32>
    %151 = arith.mulf %148, %130 : vector<8x64xf32>
    %152 = arith.mulf %147, %149 : vector<8x64xf32>
    %153 = arith.addf %151, %152 : vector<8x64xf32>
    %154 = math.tanh %153 : vector<8x64xf32>
    %155 = arith.mulf %150, %154 : vector<8x64xf32>
    %c6_i32 = arith.constant 6 : i32
    %c8_i32_52 = arith.constant 8 : i32
    %156 = arith.muli %c6_i32, %c8_i32_52 : i32
    %157 = tpu.assume_multiple %156, 8 : i32
    %158 = arith.index_cast %157 : i32 to index
    %c0_53 = arith.constant 0 : index
    %159 = vector.load %arg8[%158, %c0_53] : memref<64x256xf32, #tpu.memory_space<vmem>>, vector<8x256xf32>
    %c0_54 = arith.constant 0 : index
    %c0_55 = arith.constant 0 : index
    %160 = vector.load %arg3[%c0_54, %c0_55] : memref<64x256xf32, #tpu.memory_space<vmem>>, vector<64x256xf32>
    %cst_56 = arith.constant dense<0.000000e+00> : vector<8x256xf32>
    %161 = tpu.matmul %155, %160, %cst_56 {dimension_numbers = #tpu.dot_dimension_numbers<[1], [0], [0], [1], [0, 0, 1, 1], [], []>} : vector<8x64xf32>, vector<64x256xf32>, vector<8x256xf32> -> vector<8x256xf32>
    %162 = arith.addf %159, %161 : vector<8x256xf32>
    %163 = arith.mulf %162, %15 : vector<8x256xf32>
    %164 = math.tanh %163 : vector<8x256xf32>
    %cst_57 = arith.constant 5.000000e-01 : f32
    %165 = vector.broadcast %cst_57 : f32 to vector<8x256xf32>
    %166 = arith.mulf %165, %164 : vector<8x256xf32>
    %cst_58 = arith.constant 5.000000e-01 : f32
    %167 = vector.broadcast %cst_58 : f32 to vector<8x256xf32>
    %168 = arith.addf %166, %167 : vector<8x256xf32>
    %169 = arith.select %12, %164, %168 : vector<8x256xi1>, vector<8x256xf32>
    %170 = vector.extract_strided_slice %169 {offsets = [0, 0], sizes = [8, 64], strides = [1, 1]} : vector<8x256xf32> to vector<8x64xf32>
    %171 = vector.extract_strided_slice %169 {offsets = [0, 64], sizes = [8, 64], strides = [1, 1]} : vector<8x256xf32> to vector<8x64xf32>
    %172 = vector.extract_strided_slice %169 {offsets = [0, 128], sizes = [8, 64], strides = [1, 1]} : vector<8x256xf32> to vector<8x64xf32>
    %173 = vector.extract_strided_slice %169 {offsets = [0, 192], sizes = [8, 64], strides = [1, 1]} : vector<8x256xf32> to vector<8x64xf32>
    %174 = arith.mulf %171, %153 : vector<8x64xf32>
    %175 = arith.mulf %170, %172 : vector<8x64xf32>
    %176 = arith.addf %174, %175 : vector<8x64xf32>
    %177 = math.tanh %176 : vector<8x64xf32>
    %178 = arith.mulf %173, %177 : vector<8x64xf32>
    %c7_i32 = arith.constant 7 : i32
    %c8_i32_59 = arith.constant 8 : i32
    %179 = arith.muli %c7_i32, %c8_i32_59 : i32
    %180 = tpu.assume_multiple %179, 8 : i32
    %181 = arith.index_cast %180 : i32 to index
    %c0_60 = arith.constant 0 : index
    %182 = vector.load %arg8[%181, %c0_60] : memref<64x256xf32, #tpu.memory_space<vmem>>, vector<8x256xf32>
    %c0_61 = arith.constant 0 : index
    %c0_62 = arith.constant 0 : index
    %183 = vector.load %arg3[%c0_61, %c0_62] : memref<64x256xf32, #tpu.memory_space<vmem>>, vector<64x256xf32>
    %cst_63 = arith.constant dense<0.000000e+00> : vector<8x256xf32>
    %184 = tpu.matmul %178, %183, %cst_63 {dimension_numbers = #tpu.dot_dimension_numbers<[1], [0], [0], [1], [0, 0, 1, 1], [], []>} : vector<8x64xf32>, vector<64x256xf32>, vector<8x256xf32> -> vector<8x256xf32>
    %185 = arith.addf %182, %184 : vector<8x256xf32>
    %186 = arith.mulf %185, %15 : vector<8x256xf32>
    %187 = math.tanh %186 : vector<8x256xf32>
    %cst_64 = arith.constant 5.000000e-01 : f32
    %188 = vector.broadcast %cst_64 : f32 to vector<8x256xf32>
    %189 = arith.mulf %188, %187 : vector<8x256xf32>
    %cst_65 = arith.constant 5.000000e-01 : f32
    %190 = vector.broadcast %cst_65 : f32 to vector<8x256xf32>
    %191 = arith.addf %189, %190 : vector<8x256xf32>
    %192 = arith.select %12, %187, %191 : vector<8x256xi1>, vector<8x256xf32>
    %193 = vector.extract_strided_slice %192 {offsets = [0, 0], sizes = [8, 64], strides = [1, 1]} : vector<8x256xf32> to vector<8x64xf32>
    %194 = vector.extract_strided_slice %192 {offsets = [0, 64], sizes = [8, 64], strides = [1, 1]} : vector<8x256xf32> to vector<8x64xf32>
    %195 = vector.extract_strided_slice %192 {offsets = [0, 128], sizes = [8, 64], strides = [1, 1]} : vector<8x256xf32> to vector<8x64xf32>
    %196 = vector.extract_strided_slice %192 {offsets = [0, 192], sizes = [8, 64], strides = [1, 1]} : vector<8x256xf32> to vector<8x64xf32>
    %197 = arith.mulf %194, %176 : vector<8x64xf32>
    %198 = arith.mulf %193, %195 : vector<8x64xf32>
    %199 = arith.addf %197, %198 : vector<8x64xf32>
    %200 = math.tanh %199 : vector<8x64xf32>
    %201 = arith.mulf %196, %200 : vector<8x64xf32>
    %c8_i32_66 = arith.constant 8 : i32
    %c0_67 = arith.constant 0 : index
    %c0_68 = arith.constant 0 : index
    %202 = vector.load %arg5[%c0_67, %c0_68] : memref<64x8xf32, #tpu.memory_space<vmem>>, vector<64x8xf32>
    %cst_69 = arith.constant dense<0.000000e+00> : vector<8x8xf32>
    %203 = tpu.matmul %201, %202, %cst_69 {dimension_numbers = #tpu.dot_dimension_numbers<[1], [0], [0], [1], [0, 0, 1, 1], [], []>} : vector<8x64xf32>, vector<64x8xf32>, vector<8x8xf32> -> vector<8x8xf32>
    %c0_70 = arith.constant 0 : index
    %c0_71 = arith.constant 0 : index
    %204 = vector.load %arg6[%c0_70, %c0_71] : memref<1x8xf32, #tpu.memory_space<vmem>>, vector<1x8xf32>
    %205 = vector.broadcast %204 : vector<1x8xf32> to vector<8x8xf32>
    %206 = arith.addf %203, %205 : vector<8x8xf32>
    %cst_72 = arith.constant dense<0xFF800000> : vector<8xf32>
    %207 = vector.multi_reduction <maximumf>, %206, %cst_72 [1] : vector<8x8xf32> to vector<8xf32>
    %208 = vector.shape_cast %207 : vector<8xf32> to vector<8x1xf32>
    %209 = vector.broadcast %208 : vector<8x1xf32> to vector<8x8xf32>
    %210 = arith.subf %206, %209 : vector<8x8xf32>
    %211 = math.exp %210 : vector<8x8xf32>
    %cst_73 = arith.constant dense<0.000000e+00> : vector<8xf32>
    %212 = vector.multi_reduction <add>, %211, %cst_73 [1] : vector<8x8xf32> to vector<8xf32>
    %213 = vector.shape_cast %212 : vector<8xf32> to vector<8x1xf32>
    %214 = tpu.reciprocal %213 : vector<8x1xf32> -> vector<8x1xf32>
    %215 = vector.broadcast %214 : vector<8x1xf32> to vector<8x8xf32>
    %216 = arith.mulf %211, %215 : vector<8x8xf32>
    %c0_74 = arith.constant 0 : index
    %c0_75 = arith.constant 0 : index
    %217 = vector.load %arg7[%c0_74, %c0_75] : memref<8x8xf32, #tpu.memory_space<vmem>>, vector<8x8xf32>
    tpu.vector_store %arg7[%c0_74, %c0_75], %216 {strides = array<i32>} : memref<8x8xf32, #tpu.memory_space<vmem>>, vector<8x8xf32>,
    return
  }
  func.func @transform_0(%arg0: i32) -> (i32, i32) {
    %c0_i32 = arith.constant 0 : i32
    %c0_i32_0 = arith.constant 0 : i32
    return %arg0, %c0_i32 : i32, i32
  }
  func.func @transform_1(%arg0: i32) -> (i32, i32) {
    %c0_i32 = arith.constant 0 : i32
    %c0_i32_0 = arith.constant 0 : i32
    %c0_i32_1 = arith.constant 0 : i32
    return %c0_i32, %c0_i32_0 : i32, i32
  }
  func.func @transform_2(%arg0: i32) -> (i32, i32) {
    %c0_i32 = arith.constant 0 : i32
    %c0_i32_0 = arith.constant 0 : i32
    %c0_i32_1 = arith.constant 0 : i32
    return %c0_i32, %c0_i32_0 : i32, i32
  }
  func.func @transform_3(%arg0: i32) -> (i32, i32) {
    %c0_i32 = arith.constant 0 : i32
    %c0_i32_0 = arith.constant 0 : i32
    %c0_i32_1 = arith.constant 0 : i32
    return %c0_i32, %c0_i32_0 : i32, i32
  }
  func.func @transform_4(%arg0: i32) -> (i32, i32) {
    %c0_i32 = arith.constant 0 : i32
    %c0_i32_0 = arith.constant 0 : i32
    %c0_i32_1 = arith.constant 0 : i32
    return %c0_i32, %c0_i32_0 : i32, i32
  }
  func.func @transform_5(%arg0: i32) -> (i32, i32) {
    %c0_i32 = arith.constant 0 : i32
    %c0_i32_0 = arith.constant 0 : i32
    %c0_i32_1 = arith.constant 0 : i32
    return %c0_i32, %c0_i32_0 : i32, i32
  }
  func.func @transform_6(%arg0: i32) -> (i32, i32) {
    %c0_i32 = arith.constant 0 : i32
    %c0_i32_0 = arith.constant 0 : i32
    return %arg0, %c0_i32 : i32, i32
  }
}

</mosaic_0001>

<bundles_post_ra>
// kernel: tpu_custom_call.1
= control target key start
LH: loop header
LB: loop body
LE: loop exit
PB: predicated region body
PF: predicated region fallthrough
CT: control target
= control target key end

     0   :  { %11 = vsyncpa [#allocation4], 0  ;;  %s1791_s0 = inlined_call_operand.vmem [shape: f32[64,48], index: 0, kind: input, shape index: {}]   ;;  %s1792_s1 = inlined_call_operand.hbm [shape: f32[48,256], index: 1, kind: input, shape index: {}]   ;;  %s1793_s2 = inlined_call_operand.vmem [shape: f32[64,256], index: 2, kind: input, shape index: {}]   ;;  %s1794_s3 = inlined_call_operand.vmem [shape: f32[1,256], index: 3, kind: input, shape index: {}]   ;;  %s1795_s4 = inlined_call_operand.vmem [shape: f32[64,8], index: 4, kind: input, shape index: {}]   ;;  %s1796_s5 = inlined_call_operand.vmem [shape: f32[1,8], index: 5, kind: input, shape index: {}]   ;;  %s1797_s6 = inlined_call_operand.hbm [shape: f32[8,8], index: 6, kind: output, shape index: {}]  }
   0x1   :  { %12 = vsyncpa [#allocation5], 0  ;;  %s1340_s21 = smov [#allocation3]  }
   0x2   :  { %s20_s22 = sshll.u32 %s1340_s21, 4  ;;  %s21_s22 = int_to_ptr.vmem [resolvable:$true] %s20_s22 }
   0x3   :  { %s1304_s23 = scalar_lea.vmem %s21_s22, 1536  ;;  %p1309_p1 = scmp.lt.s32.totalorder %s21_s22, %s21_s22 }
   0x4   :  { %p1305_p0 = scmp.ne.s32.totalorder %s21_s22, %s1304_s23  ;;  %p1310_p2 = scmp.lt.s32.totalorder %s1304_s23, %s1304_s23 }
   0x6   :  { %p1311_p3 = por %p1310_p2, %p1309_p1 }
   0x8   :  { %p1312_p4 = pnand %p1311_p3, %p1305_p0 }
   0xa   :  { %1315 = shalt.err (!%p1312_p4)
}
   0xb   :  { %s1341_s24 = smov 256   ;;  %s1342_s25 = smov 16  }
   0xc   :  { %26 = dma.hbm_to_vmem [thread:$0]  %s1792_s1, 1536, %s21_s22, [#allocation4], %s1341_s24, %s1341_s24, %s1342_s25  }
   0xd   :  { %1336 = dma.done.wait [#allocation4], 1536  }
   0xe   :  { %1337 = vsyncadd [#allocation4], 4294965760  ;;  %v1343_v0 = vmov 0.0   ;;  %v57_v1 = vld [vmem:[#allocation3 + $0x58] sm:$0xff]  ;;  %v56_v3 = vld [vmem:[#allocation3 + $0x50] sm:$0xff]  ;;  %vm70_vm0 = vcmask 392192   ;;  %v60_v30 = vlaneseq }
   0xf   :  { %159 = vmatprep.mubr.f32.mxu0 %v1343_v0  ;;  %324 = vmatprep.mubr.f32.mxu1 %v1343_v0  ;;  %v1391_v2 = vld [vmem:[%s1793_s2 + $0x78] sm:$0xff]  ;;  %v1397_v4 = vld [vmem:[%s1793_s2 + $0x70] sm:$0xff]  ;;  %v55_v5 = vld [vmem:[#allocation3 + $0x48] sm:$0xff]  ;;  %v1344_v45 = vmov 0.5   ;;  %vm256_vm2 = vcmask 523264   ;;  %vm1346_vm3 = vmmov 0  }
  0x10   :  { %115 = vmatprep.subr.mxu0 %v57_v1  ;;  %276 = vmatprep.subr.mxu1 %v1391_v2  ;;  %v1402_v6 = vld [vmem:[%s1793_s2 + $0x68] sm:$0xff]  ;;  %v54_v7 = vld [vmem:[#allocation3 + $0x40] sm:$0xff]  ;;  %v53_v9 = vld [vmem:[#allocation3 + $0x38] sm:$0xff]  ;;  %v61_v31 = vshrl.u32 %v60_v30, 7  ;;  %v225_v34 = vand.u32 127, %v60_v30  ;;  %vm1156_vm4 = vcmask 64512  }
  0x11   :  { %116 = vmatpush1.msra.mxu0 %v56_v3  ;;  %277 = vmatpush1.msra.mxu1 %v1397_v4  ;;  %v1408_v8 = vld [vmem:[%s1793_s2 + $0x60] sm:$0xff]  ;;  %v1414_v10 = vld [vmem:[%s1793_s2 + $0x58] sm:$0xff]  ;;  %v52_v11 = vld [vmem:[#allocation3 + $0x30] sm:$0xff] }
  0x12   :  { %117 = vmatprep.subr.mxu0 %v55_v5  ;;  %278 = vmatprep.subr.mxu1 %v1402_v6  ;;  %v1419_v12 = vld [vmem:[%s1793_s2 + $0x50] sm:$0xff]  ;;  %v51_v13 = vld [vmem:[#allocation3 + $0x28] sm:$0xff]  ;;  %v50_v15 = vld [vmem:[#allocation3 + $0x20] sm:$0xff]  ;;  %v62_v32 = vsub.s32 0, %v61_v31  ;;  %v66_v36 = vsub.s32 1, %v61_v31  ;;  %v1530_v37 = vadd.s32 128, %v225_v34 }
  0x13   :  { %118 = vmatpush1.msra.mxu0 %v54_v7  ;;  %279 = vmatpush1.msra.mxu1 %v1408_v8  ;;  %v1425_v14 = vld [vmem:[%s1793_s2 + $0x48] sm:$0xff]  ;;  %v1431_v16 = vld [vmem:[%s1793_s2 + $0x40] sm:$0xff]  ;;  %v49_v17 = vld [vmem:[#allocation3 + $0x18] sm:$0xff] }
  0x14   :  { %119 = vmatprep.subr.mxu0 %v53_v9  ;;  %280 = vmatprep.subr.mxu1 %v1414_v10  ;;  %v1437_v18 = vld [vmem:[%s1793_s2 + $0x38] sm:$0xff]  ;;  %v48_v19 = vld [vmem:[#allocation3 + $0x10] sm:$0xff]  ;;  %v47_v21 = vld [vmem:[#allocation3 + $0x8] sm:$0xff]  ;;  %vm230_vm1 = vcmp.lt.s32.totalorder %v1530_v37, 192 }
  0x15   :  { %120 = vmatpush1.msra.mxu0 %v52_v11  ;;  %281 = vmatpush1.msra.mxu1 %v1419_v12  ;;  %v1443_v20 = vld [vmem:[%s1793_s2 + $0x30] sm:$0xff]  ;;  %v1449_v22 = vld [vmem:[%s1793_s2 + $0x28] sm:$0xff]  ;;  %v46_v23 = vld [vmem:[#allocation3] sm:$0xff]  ;;  %v1539_v46 = vsel %vm230_vm1, 1.0, %v1344_v45 }
  0x16   :  { %121 = vmatprep.subr.mxu0 %v51_v13  ;;  %282 = vmatprep.subr.mxu1 %v1425_v14  ;;  %v1455_v24 = vld [vmem:[%s1793_s2 + $0x20] sm:$0xff]  ;;  %v1464_v26 = vld [vmem:[%s1793_s2 + $0x18] sm:$0xff]  ;;  %v1470_v27 = vld [vmem:[%s1793_s2 + $0x10] sm:$0xff] }
  0x17   :  { %122 = vmatpush1.msra.mxu0 %v50_v15  ;;  %283 = vmatpush1.msra.mxu1 %v1431_v16  ;;  %v38_v25 = vld [vmem:[%s1791_s0] sm:$0xff]  ;;  %v1476_v28 = vld [vmem:[%s1793_s2 + $0x8] sm:$0xff]  ;;  %v45_v45 = vld [vmem:[%s1791_s0 + $0x38] sm:$0xff] }
  0x18   :  { %123 = vmatprep.subr.mxu0 %v49_v17  ;;  %284 = vmatprep.subr.mxu1 %v1437_v18  ;;  %v1483_v29 = vld [vmem:[%s1793_s2] sm:$0xff]  ;;  %v39_v59 = vld [vmem:[%s1791_s0 + $0x8] sm:$0xff] }
  0x19   :  { %124 = vmatpush1.msra.mxu0 %v48_v19  ;;  %285 = vmatpush1.msra.mxu1 %v1443_v20  ;;  %v58_v33 = vld [vmem:[%s1794_s3] sm:$0x3]  ;;  %s1345_s3 = smov 64   ;;  %v1071_v37 = vld [vmem:[%s1795_s4 + $0x28] sm:$0xff] }
  0x1a   :  { %125 = vmatprep.subr.mxu0 %v47_v21  ;;  %286 = vmatprep.subr.mxu1 %v1449_v22  ;;  %v1528_v35 = vrot.slane %v58_v33, %v62_v32  ;;  %v1533_v40 = vrot.slane %v58_v33, %v66_v36 }
  0x1b   :  { %126 = vmatpush1.msra.mxu0 %v46_v23  ;;  %287 = vmatpush1.msra.mxu1 %v1455_v24 }
  0x1c   :  { %1191 = vmatmul.mubr.msk.f32.vlgmr.msra.gmra.mxu0 %vm70_vm0, %v38_v25  ;;  %288 = vmatprep.subr.mxu1 %v1464_v26 }
  0x1d   :  { %289 = vmatpush1.msra.mxu1 %v1470_v27  ;;  %165 = vmatprep.mubr.f32.mxu0 %v1343_v0 }
  0x1e   :  { %290 = vmatprep.subr.mxu1 %v1476_v28  ;;  %480 = vmatprep.subr.mxu0 %v1391_v2 }
  0x1f   :  { %291 = vmatpush1.msra.mxu1 %v1483_v29  ;;  %481 = vmatpush1.msra.mxu0 %v1397_v4 }
  0x20   :  { %325 = vmatmul.mubr.f32.vlgmr.msra.gmra.mxu1 %v1343_v0  ;;  %378 = vmatprep.subr.mxu1 %v1391_v2 }
  0x21   :  { %379 = vmatpush1.msra.mxu1 %v1397_v4  ;;  %426 = vmatprep.mubr.f32.mxu1 %v1343_v0 }
  0x22   :  { %380 = vmatprep.subr.mxu1 %v1402_v6  ;;  %482 = vmatprep.subr.mxu0 %v1402_v6 }
  0x23   :  { %381 = vmatpush1.msra.mxu1 %v1408_v8  ;;  %483 = vmatpush1.msra.mxu0 %v1408_v8 }
  0x24   :  { %382 = vmatprep.subr.mxu1 %v1414_v10  ;;  %484 = vmatprep.subr.mxu0 %v1414_v10 }
  0x25   :  { %383 = vmatpush1.msra.mxu1 %v1419_v12  ;;  %485 = vmatpush1.msra.mxu0 %v1419_v12 }
  0x26   :  { %384 = vmatprep.subr.mxu1 %v1425_v14  ;;  %486 = vmatprep.subr.mxu0 %v1425_v14 }
  0x27   :  { %385 = vmatpush1.msra.mxu1 %v1431_v16  ;;  %487 = vmatpush1.msra.mxu0 %v1431_v16 }
  0x28   :  { %386 = vmatprep.subr.mxu1 %v1437_v18  ;;  %488 = vmatprep.subr.mxu0 %v1437_v18 }
  0x29   :  { %387 = vmatpush1.msra.mxu1 %v1443_v20  ;;  %489 = vmatpush1.msra.mxu0 %v1443_v20 }
  0x2a   :  { %388 = vmatprep.subr.mxu1 %v1449_v22  ;;  %490 = vmatprep.subr.mxu0 %v1449_v22 }
  0x2b   :  { %389 = vmatpush1.msra.mxu1 %v1455_v24  ;;  %491 = vmatpush1.msra.mxu0 %v1455_v24 }
  0x2c   :  { %390 = vmatprep.subr.mxu1 %v1464_v26  ;;  %492 = vmatprep.subr.mxu0 %v1464_v26 }
  0x2d   :  { %391 = vmatpush1.msra.mxu1 %v1470_v27  ;;  %493 = vmatpush1.msra.mxu0 %v1470_v27 }
  0x2e   :  { %392 = vmatprep.subr.mxu1 %v1476_v28  ;;  %494 = vmatprep.subr.mxu0 %v1476_v28 }
  0x2f   :  { %393 = vmatpush1.msra.mxu1 %v1483_v29  ;;  %495 = vmatpush1.msra.mxu0 %v1483_v29 }
  0x30   :  { %582 = vmatprep.subr.mxu1 %v1391_v2  ;;  %684 = vmatprep.subr.mxu0 %v1391_v2 }
  0x31   :  { %1192 = vmatmul.mubr.msk.f32.gmra.mxu0 %vm70_vm0, %v39_v59 }
  0x32   :  { %171 = vmatprep.mubr.f32.mxu0 %v1343_v0 }
  0xdc   :  { %v161_v38 = vpop.f32.mrf.mxu0 }
  0xdd   :  { %v162_v39 = vadd.f32 %v161_v38, %v1528_v35 }
  0xde   :  { %v163_v41 = vpop.f32.mrf.mxu0 }
  0xdf   :  { %v164_v43 = vadd.f32 %v163_v41, %v1533_v40  ;;  %v41_v41 = vld [vmem:[%s1791_s0 + $0x18] sm:$0xff] }
  0xe0   :  { %v326_v42 = vpop.f32.mrf.mxu1 }
  0xe1   :  { %v331_v44 = vadd.f32 %v326_v42, %v162_v39  ;;  %v40_v39 = vld [vmem:[%s1791_s0 + $0x10] sm:$0xff]  ;;  %v42_v42 = vld [vmem:[%s1791_s0 + $0x20] sm:$0xff] }
  0xe2   :  { %v328_v47 = vpop.f32.mrf.mxu1  ;;  %1193 = vmatmul.mubr.msk.f32.gmra.mxu0 %vm70_vm0, %v40_v39 }
  0xe3   :  { %v333_v48 = vmul.f32 0.5, %v331_v44  ;;  %v332_v49 = vadd.f32 %v328_v47, %v164_v43  ;;  %177 = vmatprep.mubr.f32.mxu0 %v1343_v0  ;;  %v43_v43 = vld [vmem:[%s1791_s0 + $0x28] sm:$0xff]  ;;  %v44_v44 = vld [vmem:[%s1791_s0 + $0x30] sm:$0xff] }
  0xe5   :  { %1244 = vtanh.f32 %v333_v48  ;;  %v334_v50 = vmul.f32 %v332_v49, %v1539_v46 }
  0xe6   :  { %1194 = vmatmul.mubr.msk.f32.gmra.mxu0 %vm70_vm0, %v41_v41 }
  0xe7   :  { %1246 = vtanh.f32 %v334_v50  ;;  %183 = vmatprep.mubr.f32.mxu0 %v1343_v0 }
  0xea   :  { %1195 = vmatmul.mubr.msk.f32.gmra.mxu0 %vm70_vm0, %v42_v42 }
  0xeb   :  { %189 = vmatprep.mubr.f32.mxu0 %v1343_v0 }
  0xee   :  { %1196 = vmatmul.mubr.msk.f32.gmra.mxu0 %vm70_vm0, %v43_v43 }
  0xef   :  { %195 = vmatprep.mubr.f32.mxu0 %v1343_v0 }
  0xf1   :  { %v167_v5 = vpop.f32.mrf.mxu0 }
  0xf2   :  { %v1245_v51 = vpop.eup %1244  ;;  %v168_v7 = vadd.f32 %v167_v5, %v1528_v35  ;;  %1197 = vmatmul.mubr.msk.f32.gmra.mxu0 %vm70_vm0, %v44_v44 }
  0xf3   :  { %v337_v53 = vmul.f32 0.5, %v1245_v51  ;;  %v169_v9 = vpop.f32.mrf.mxu0  ;;  %201 = vmatprep.mubr.f32.mxu0 %v1343_v0 }
  0xf4   :  { %v1247_v52 = vpop.eup %1246  ;;  %v170_v13 = vadd.f32 %v169_v9, %v1533_v40 }
  0xf5   :  { %v338_v54 = vmul.f32 0.5, %v1247_v52  ;;  %v339_v56 = vadd.f32 0.5, %v337_v53 }
  0xf6   :  { %1198 = vmatmul.mubr.msk.f32.gmra.mxu0 %vm70_vm0, %v45_v45 }
  0xf7   :  { %v340_v55 = vadd.f32 0.5, %v338_v54  ;;  %v343_v60 = vmul.f32 0.0, %v339_v56  ;;  %528 = vmatprep.mubr.f32.mxu0 %v1343_v0 }
  0xf9   :  { %v342_v57 = vsel %vm230_vm1, %v1247_v52, %v340_v55 }
  0xfa   :  { %v344_v58 = vmul.f32 %v342_v57, %v339_v56 }
  0xfc   :  { %346 = vrot.lane.b32.xlu0 %v344_v58, %s1345_s3 }
 0x16e   :  { %v347_v61 = vpop.permute.xlu0 %346 }
 0x16f   :  { %v1550_v62 = vadd.f32 %v347_v61, %v343_v60 }
 0x171   :  { %1248 = vtanh.f32 %v1550_v62 }
 0x17e   :  { %v1249_v63 = vpop.eup %1248 }
 0x17f   :  { %v351_v1 = vmul.f32 %v1249_v63, %v342_v57 }
 0x181   :  { %358 = vrot.lane.b32.xlu0 %v351_v1, %s1345_s3 }
 0x1a2   :  { %v173_v53 = vpop.f32.mrf.mxu0 }
 0x1a4   :  { %v175_v54 = vpop.f32.mrf.mxu0 }
 0x1a6   :  { %v179_v55 = vpop.f32.mrf.mxu0 }
 0x1a7   :  { %v180_v43 = vadd.f32 %v179_v55, %v1528_v35 }
 0x1a8   :  { %v181_v56 = vpop.f32.mrf.mxu0 }
 0x1a9   :  { %v182_v45 = vadd.f32 %v181_v56, %v1533_v40 }
 0x1aa   :  { %v1628_v57 = vpop.f32.mrf.mxu0 }
 0x1ac   :  { %v1630_v58 = vpop.f32.mrf.mxu0 }
 0x1ae   :  { %v1632_v59 = vpop.f32.mrf.mxu0 }
 0x1b0   :  { %v1634_v60 = vpop.f32.mrf.mxu0 }
 0x1b2   :  { %v1636_v61 = vpop.f32.mrf.mxu0 }
 0x1f3   :  { %v359_v3 = vpop.permute.xlu0 %358 }
 0x1f4   :  { %1199 = vmatmul.mubr.msk.f32.vlgmr.msra.gmra.mxu1 %vm256_vm2, %v359_v3  ;;  %v174_v3 = vadd.f32 %v173_v53, %v1528_v35 }
 0x1f5   :  { %583 = vmatpush1.msra.mxu1 %v1397_v4  ;;  %630 = vmatprep.mubr.f32.mxu1 %v1343_v0 }
 0x1f6   :  { %584 = vmatprep.subr.mxu1 %v1402_v6 }
 0x1f7   :  { %585 = vmatpush1.msra.mxu1 %v1408_v8 }
 0x1f8   :  { %586 = vmatprep.subr.mxu1 %v1414_v10 }
 0x1f9   :  { %587 = vmatpush1.msra.mxu1 %v1419_v12 }
 0x1fa   :  { %588 = vmatprep.subr.mxu1 %v1425_v14 }
 0x1fb   :  { %589 = vmatpush1.msra.mxu1 %v1431_v16 }
 0x1fc   :  { %590 = vmatprep.subr.mxu1 %v1437_v18 }
 0x1fd   :  { %591 = vmatpush1.msra.mxu1 %v1443_v20 }
 0x1fe   :  { %592 = vmatprep.subr.mxu1 %v1449_v22 }
 0x1ff   :  { %593 = vmatpush1.msra.mxu1 %v1455_v24 }
 0x200   :  { %594 = vmatprep.subr.mxu1 %v1464_v26 }
 0x201   :  { %595 = vmatpush1.msra.mxu1 %v1470_v27 }
 0x202   :  { %596 = vmatprep.subr.mxu1 %v1476_v28 }
 0x203   :  { %597 = vmatpush1.msra.mxu1 %v1483_v29 }
 0x204   :  { %786 = vmatprep.subr.mxu1 %v1391_v2 }
 0x2b4   :  { %v428_v11 = vpop.f32.mrf.mxu1 }
 0x2b5   :  { %v433_v15 = vadd.f32 %v428_v11, %v168_v7  ;;  %v176_v7 = vadd.f32 %v175_v54, %v1533_v40 }
 0x2b6   :  { %v430_v17 = vpop.f32.mrf.mxu1 }
 0x2b7   :  { %v435_v19 = vmul.f32 0.5, %v433_v15  ;;  %v434_v21 = vadd.f32 %v430_v17, %v170_v13 }
 0x2b9   :  { %1250 = vtanh.f32 %v435_v19  ;;  %v436_v23 = vmul.f32 %v434_v21, %v1539_v46 }
 0x2bb   :  { %1252 = vtanh.f32 %v436_v23 }
 0x2c6   :  { %v1251_v25 = vpop.eup %1250 }
 0x2c7   :  { %v439_v31 = vmul.f32 0.5, %v1251_v25 }
 0x2c8   :  { %v1253_v30 = vpop.eup %1252 }
 0x2c9   :  { %v440_v32 = vmul.f32 0.5, %v1253_v30  ;;  %v441_v34 = vadd.f32 0.5, %v439_v31 }
 0x2cb   :  { %v442_v33 = vadd.f32 0.5, %v440_v32  ;;  %v445_v47 = vmul.f32 %v441_v34, %v1550_v62  ;;  %v1638_v62 = vpop.f32.mrf.mxu0 }
 0x2cd   :  { %v444_v36 = vsel %vm230_vm1, %v1253_v30, %v442_v33  ;;  %v1640_v63 = vpop.f32.mrf.mxu0 }
 0x2ce   :  { %v446_v38 = vmul.f32 %v444_v36, %v441_v34 }
 0x2cf   :  { %v1642_v1 = vpop.f32.mrf.mxu0 }
 0x2d0   :  { %448 = vrot.lane.b32.xlu1 %v446_v38, %s1345_s3 }
 0x342   :  { %v449_v48 = vpop.permute.xlu1 %448 }
 0x343   :  { %v451_v49 = vadd.f32 %v449_v48, %v445_v47 }
 0x345   :  { %1254 = vtanh.f32 %v451_v49 }
 0x352   :  { %v1255_v50 = vpop.eup %1254 }
 0x353   :  { %v453_v51 = vmul.f32 %v1255_v50, %v444_v36 }
 0x355   :  { %460 = vrot.lane.b32.xlu1 %v453_v51, %s1345_s3 }
 0x3c7   :  { %v461_v52 = vpop.permute.xlu1 %460 }
 0x3c8   :  { %1200 = vmatmul.mubr.msk.f32.vlgmr.msra.gmra.mxu0 %vm256_vm2, %v461_v52 }
 0x3c9   :  { %685 = vmatpush1.msra.mxu0 %v1397_v4  ;;  %732 = vmatprep.mubr.f32.mxu0 %v1343_v0 }
 0x3ca   :  { %686 = vmatprep.subr.mxu0 %v1402_v6 }
 0x3cb   :  { %687 = vmatpush1.msra.mxu0 %v1408_v8 }
 0x3cc   :  { %688 = vmatprep.subr.mxu0 %v1414_v10 }
 0x3cd   :  { %689 = vmatpush1.msra.mxu0 %v1419_v12 }
 0x3ce   :  { %690 = vmatprep.subr.mxu0 %v1425_v14 }
 0x3cf   :  { %691 = vmatpush1.msra.mxu0 %v1431_v16 }
 0x3d0   :  { %692 = vmatprep.subr.mxu0 %v1437_v18 }
 0x3d1   :  { %693 = vmatpush1.msra.mxu0 %v1443_v20 }
 0x3d2   :  { %694 = vmatprep.subr.mxu0 %v1449_v22 }
 0x3d3   :  { %695 = vmatpush1.msra.mxu0 %v1455_v24 }
 0x3d4   :  { %696 = vmatprep.subr.mxu0 %v1464_v26 }
 0x3d5   :  { %697 = vmatpush1.msra.mxu0 %v1470_v27 }
 0x3d6   :  { %698 = vmatprep.subr.mxu0 %v1476_v28 }
 0x3d7   :  { %699 = vmatpush1.msra.mxu0 %v1483_v29 }
 0x3d8   :  { %888 = vmatprep.subr.mxu0 %v1391_v2 }
 0x488   :  { %v530_v5 = vpop.f32.mrf.mxu0 }
 0x489   :  { %v535_v9 = vadd.f32 %v530_v5, %v174_v3 }
 0x48a   :  { %v532_v11 = vpop.f32.mrf.mxu0 }
 0x48b   :  { %v537_v13 = vmul.f32 0.5, %v535_v9  ;;  %v536_v15 = vadd.f32 %v532_v11, %v176_v7 }
 0x48d   :  { %1256 = vtanh.f32 %v537_v13  ;;  %v538_v17 = vmul.f32 %v536_v15, %v1539_v46 }
 0x48f   :  { %1258 = vtanh.f32 %v538_v17 }
 0x49a   :  { %v1257_v19 = vpop.eup %1256 }
 0x49b   :  { %v541_v23 = vmul.f32 0.5, %v1257_v19  ;;  %v186_v19 = vadd.f32 %v1628_v57, %v1528_v35 }
 0x49c   :  { %v1259_v21 = vpop.eup %1258 }
 0x49d   :  { %v542_v25 = vmul.f32 0.5, %v1259_v21  ;;  %v543_v31 = vadd.f32 0.5, %v541_v23  ;;  %v188_v23 = vadd.f32 %v1630_v58, %v1533_v40 }
 0x49f   :  { %v544_v30 = vadd.f32 0.5, %v542_v25  ;;  %v547_v34 = vmul.f32 %v543_v31, %v451_v49 }
 0x4a1   :  { %v546_v32 = vsel %vm230_vm1, %v1259_v21, %v544_v30 }
 0x4a2   :  { %v548_v33 = vmul.f32 %v546_v32, %v543_v31 }
 0x4a4   :  { %550 = vrot.lane.b32.xlu0 %v548_v33, %s1345_s3 }
 0x516   :  { %v551_v36 = vpop.permute.xlu0 %550 }
 0x517   :  { %v553_v38 = vadd.f32 %v551_v36, %v547_v34 }
 0x519   :  { %1260 = vtanh.f32 %v553_v38 }
 0x526   :  { %v1261_v39 = vpop.eup %1260 }
 0x527   :  { %v555_v41 = vmul.f32 %v1261_v39, %v546_v32 }
 0x529   :  { %562 = vrot.lane.b32.xlu1 %v555_v41, %s1345_s3 }
 0x59b   :  { %v563_v42 = vpop.permute.xlu1 %562 }
 0x59c   :  { %1201 = vmatmul.mubr.msk.f32.vlgmr.msra.gmra.mxu1 %vm256_vm2, %v563_v42 }
 0x59d   :  { %787 = vmatpush1.msra.mxu1 %v1397_v4  ;;  %834 = vmatprep.mubr.f32.mxu1 %v1343_v0 }
 0x59e   :  { %788 = vmatprep.subr.mxu1 %v1402_v6 }
 0x59f   :  { %789 = vmatpush1.msra.mxu1 %v1408_v8 }
 0x5a0   :  { %790 = vmatprep.subr.mxu1 %v1414_v10 }
 0x5a1   :  { %791 = vmatpush1.msra.mxu1 %v1419_v12 }
 0x5a2   :  { %792 = vmatprep.subr.mxu1 %v1425_v14 }
 0x5a3   :  { %793 = vmatpush1.msra.mxu1 %v1431_v16 }
 0x5a4   :  { %794 = vmatprep.subr.mxu1 %v1437_v18 }
 0x5a5   :  { %795 = vmatpush1.msra.mxu1 %v1443_v20 }
 0x5a6   :  { %796 = vmatprep.subr.mxu1 %v1449_v22 }
 0x5a7   :  { %797 = vmatpush1.msra.mxu1 %v1455_v24 }
 0x5a8   :  { %798 = vmatprep.subr.mxu1 %v1464_v26 }
 0x5a9   :  { %799 = vmatpush1.msra.mxu1 %v1470_v27 }
 0x5aa   :  { %800 = vmatprep.subr.mxu1 %v1476_v28 }
 0x5ab   :  { %801 = vmatpush1.msra.mxu1 %v1483_v29 }
 0x5ac   :  { %990 = vmatprep.subr.mxu1 %v1391_v2 }
 0x65c   :  { %v632_v44 = vpop.f32.mrf.mxu1 }
 0x65d   :  { %v637_v47 = vadd.f32 %v632_v44, %v180_v43 }
 0x65e   :  { %v634_v48 = vpop.f32.mrf.mxu1 }
 0x65f   :  { %v639_v49 = vmul.f32 0.5, %v637_v47  ;;  %v638_v50 = vadd.f32 %v634_v48, %v182_v45 }
 0x661   :  { %1262 = vtanh.f32 %v639_v49  ;;  %v640_v51 = vmul.f32 %v638_v50, %v1539_v46 }
 0x663   :  { %1264 = vtanh.f32 %v640_v51 }
 0x66e   :  { %v1263_v52 = vpop.eup %1262 }
 0x66f   :  { %v643_v54 = vmul.f32 0.5, %v1263_v52 }
 0x670   :  { %v1265_v53 = vpop.eup %1264 }
 0x671   :  { %v644_v3 = vmul.f32 0.5, %v1265_v53  ;;  %v645_v7 = vadd.f32 0.5, %v643_v54 }
 0x673   :  { %v646_v5 = vadd.f32 0.5, %v644_v3  ;;  %v649_v56 = vmul.f32 %v645_v7, %v553_v38  ;;  %v198_v3 = vadd.f32 %v1636_v61, %v1528_v35 }
 0x675   :  { %v648_v2 = vsel %vm230_vm1, %v1265_v53, %v646_v5 }
 0x676   :  { %v650_v55 = vmul.f32 %v648_v2, %v645_v7  ;;  %v200_v7 = vadd.f32 %v1638_v62, %v1533_v40 }
 0x678   :  { %652 = vrot.lane.b32.xlu0 %v650_v55, %s1345_s3 }
 0x6ea   :  { %v653_v9 = vpop.permute.xlu0 %652 }
 0x6eb   :  { %v655_v11 = vadd.f32 %v653_v9, %v649_v56 }
 0x6ed   :  { %1266 = vtanh.f32 %v655_v11 }
 0x6fa   :  { %v1267_v13 = vpop.eup %1266 }
 0x6fb   :  { %v657_v15 = vmul.f32 %v1267_v13, %v648_v2 }
 0x6fd   :  { %664 = vrot.lane.b32.xlu1 %v657_v15, %s1345_s3 }
 0x76f   :  { %v665_v17 = vpop.permute.xlu1 %664 }
 0x770   :  { %1202 = vmatmul.mubr.msk.f32.vlgmr.msra.gmra.mxu0 %vm256_vm2, %v665_v17 }
 0x771   :  { %889 = vmatpush1.msra.mxu0 %v1397_v4  ;;  %936 = vmatprep.mubr.f32.mxu0 %v1343_v0 }
 0x772   :  { %890 = vmatprep.subr.mxu0 %v1402_v6 }
 0x773   :  { %891 = vmatpush1.msra.mxu0 %v1408_v8 }
 0x774   :  { %892 = vmatprep.subr.mxu0 %v1414_v10 }
 0x775   :  { %893 = vmatpush1.msra.mxu0 %v1419_v12 }
 0x776   :  { %894 = vmatprep.subr.mxu0 %v1425_v14 }
 0x777   :  { %895 = vmatpush1.msra.mxu0 %v1431_v16 }
 0x778   :  { %896 = vmatprep.subr.mxu0 %v1437_v18 }
 0x779   :  { %897 = vmatpush1.msra.mxu0 %v1443_v20 }
 0x77a   :  { %898 = vmatprep.subr.mxu0 %v1449_v22 }
 0x77b   :  { %899 = vmatpush1.msra.mxu0 %v1455_v24 }
 0x77c   :  { %900 = vmatprep.subr.mxu0 %v1464_v26 }
 0x77d   :  { %901 = vmatpush1.msra.mxu0 %v1470_v27 }
 0x77e   :  { %902 = vmatprep.subr.mxu0 %v1476_v28 }
 0x77f   :  { %903 = vmatpush1.msra.mxu0 %v1483_v29 }
 0x780   :  { %1217 = vmatprep.subr.mxu0 %v1343_v0 }
 0x830   :  { %v734_v21 = vpop.f32.mrf.mxu0 }
 0x831   :  { %v739_v25 = vadd.f32 %v734_v21, %v186_v19 }
 0x832   :  { %v736_v30 = vpop.f32.mrf.mxu0 }
 0x833   :  { %v741_v31 = vmul.f32 0.5, %v739_v25  ;;  %v740_v32 = vadd.f32 %v736_v30, %v188_v23 }
 0x835   :  { %1268 = vtanh.f32 %v741_v31  ;;  %v742_v33 = vmul.f32 %v740_v32, %v1539_v46 }
 0x837   :  { %1270 = vtanh.f32 %v742_v33 }
 0x842   :  { %v1269_v34 = vpop.eup %1268 }
 0x843   :  { %v745_v38 = vmul.f32 0.5, %v1269_v34 }
 0x844   :  { %v1271_v36 = vpop.eup %1270 }
 0x845   :  { %v746_v39 = vmul.f32 0.5, %v1271_v36  ;;  %v747_v42 = vadd.f32 0.5, %v745_v38 }
 0x847   :  { %v748_v41 = vadd.f32 0.5, %v746_v39  ;;  %v751_v58 = vmul.f32 %v747_v42, %v655_v11  ;;  %v206_v39 = vadd.f32 %v1642_v1, %v1533_v40  ;;  %v1070_v1 = vld [vmem:[%s1795_s4 + $0x20] sm:$0xff] }
 0x849   :  { %v750_v57 = vsel %vm230_vm1, %v1271_v36, %v748_v41  ;;  %v204_v36 = vadd.f32 %v1640_v63, %v1528_v35 }
 0x84a   :  { %v752_v43 = vmul.f32 %v750_v57, %v747_v42 }
 0x84c   :  { %754 = vrot.lane.b32.xlu0 %v752_v43, %s1345_s3 }
 0x8be   :  { %v755_v44 = vpop.permute.xlu0 %754 }
 0x8bf   :  { %v757_v45 = vadd.f32 %v755_v44, %v751_v58 }
 0x8c1   :  { %1272 = vtanh.f32 %v757_v45 }
 0x8ce   :  { %v1273_v47 = vpop.eup %1272 }
 0x8cf   :  { %v759_v48 = vmul.f32 %v1273_v47, %v750_v57 }
 0x8d1   :  { %766 = vrot.lane.b32.xlu1 %v759_v48, %s1345_s3 }
 0x943   :  { %v767_v49 = vpop.permute.xlu1 %766 }
 0x944   :  { %1203 = vmatmul.mubr.msk.f32.vlgmr.msra.gmra.mxu1 %vm256_vm2, %v767_v49 }
 0x945   :  { %991 = vmatpush1.msra.mxu1 %v1397_v4  ;;  %1038 = vmatprep.mubr.f32.mxu1 %v1343_v0  ;;  %v192_v4 = vadd.f32 %v1632_v59, %v1528_v35 }
 0x946   :  { %992 = vmatprep.subr.mxu1 %v1402_v6 }
 0x947   :  { %993 = vmatpush1.msra.mxu1 %v1408_v8  ;;  %v194_v8 = vadd.f32 %v1634_v60, %v1533_v40  ;;  %v1073_v40 = vld [vmem:[%s1795_s4 + $0x38] sm:$0xff] }
 0x948   :  { %994 = vmatprep.subr.mxu1 %v1414_v10 }
 0x949   :  { %995 = vmatpush1.msra.mxu1 %v1419_v12 }
 0x94a   :  { %996 = vmatprep.subr.mxu1 %v1425_v14 }
 0x94b   :  { %997 = vmatpush1.msra.mxu1 %v1431_v16 }
 0x94c   :  { %998 = vmatprep.subr.mxu1 %v1437_v18 }
 0x94d   :  { %999 = vmatpush1.msra.mxu1 %v1443_v20 }
 0x94e   :  { %1000 = vmatprep.subr.mxu1 %v1449_v22 }
 0x94f   :  { %1001 = vmatpush1.msra.mxu1 %v1455_v24 }
 0x950   :  { %1002 = vmatprep.subr.mxu1 %v1464_v26 }
 0x951   :  { %1003 = vmatpush1.msra.mxu1 %v1470_v27 }
 0x952   :  { %1004 = vmatprep.subr.mxu1 %v1476_v28 }
 0x953   :  { %1005 = vmatpush1.msra.mxu1 %v1483_v29 }
 0xa04   :  { %v836_v6 = vpop.f32.mrf.mxu1 }
 0xa05   :  { %v841_v10 = vadd.f32 %v836_v6, %v192_v4  ;;  %v1069_v6 = vld [vmem:[%s1795_s4 + $0x18] sm:$0xff] }
 0xa06   :  { %v838_v12 = vpop.f32.mrf.mxu1 }
 0xa07   :  { %v843_v14 = vmul.f32 0.5, %v841_v10  ;;  %v842_v16 = vadd.f32 %v838_v12, %v194_v8  ;;  %v1068_v8 = vld [vmem:[%s1795_s4 + $0x10] sm:$0xff]  ;;  %v1067_v10 = vld [vmem:[%s1795_s4 + $0x8] sm:$0xff]  ;;  %v1066_v12 = vld [vmem:[%s1795_s4] sm:$0xff] }
 0xa09   :  { %1274 = vtanh.f32 %v843_v14  ;;  %v844_v18 = vmul.f32 %v842_v16, %v1539_v46 }
 0xa0b   :  { %1276 = vtanh.f32 %v844_v18 }
 0xa16   :  { %v1275_v20 = vpop.eup %1274 }
 0xa17   :  { %v847_v24 = vmul.f32 0.5, %v1275_v20 }
 0xa18   :  { %v1277_v22 = vpop.eup %1276 }
 0xa19   :  { %v848_v26 = vmul.f32 0.5, %v1277_v22  ;;  %v849_v28 = vadd.f32 0.5, %v847_v24 }
 0xa1b   :  { %v850_v27 = vadd.f32 0.5, %v848_v26  ;;  %v853_v60 = vmul.f32 %v849_v28, %v757_v45  ;;  %v1206_v26 = vld [vmem:[%s1796_s5] ss:$0 sm:$0xff] }
 0xa1d   :  { %v852_v29 = vsel %vm230_vm1, %v1277_v22, %v850_v27 }
 0xa1e   :  { %v854_v59 = vmul.f32 %v852_v29, %v849_v28 }
 0xa20   :  { %856 = vrot.lane.b32.xlu0 %v854_v59, %s1345_s3 }
 0xa92   :  { %v857_v50 = vpop.permute.xlu0 %856 }
 0xa93   :  { %v859_v51 = vadd.f32 %v857_v50, %v853_v60 }
 0xa95   :  { %1278 = vtanh.f32 %v859_v51 }
 0xaa2   :  { %v1279_v52 = vpop.eup %1278 }
 0xaa3   :  { %v861_v53 = vmul.f32 %v1279_v52, %v852_v29 }
 0xaa5   :  { %868 = vrot.lane.b32.xlu1 %v861_v53, %s1345_s3 }
 0xb17   :  { %v869_v54 = vpop.permute.xlu1 %868 }
 0xb18   :  { %1204 = vmatmul.mubr.msk.f32.vlgmr.msra.gmra.mxu0 %vm256_vm2, %v869_v54 }
 0xb19   :  { %1218 = vmatpush3.msra.mxu0 %v1073_v40  ;;  %1233 = vmatprep.mubr.msk.f32.mxu0 %vm1346_vm3, %v1343_v0 }
 0xb1a   :  { %1219 = vmatprep.subr.mxu0 %v1343_v0 }
 0xbd8   :  { %v938_v5 = vpop.f32.mrf.mxu0 }
 0xbd9   :  { %v943_v2 = vadd.f32 %v938_v5, %v198_v3 }
 0xbda   :  { %v940_v55 = vpop.f32.mrf.mxu0 }
 0xbdb   :  { %v945_v56 = vmul.f32 0.5, %v943_v2  ;;  %v944_v9 = vadd.f32 %v940_v55, %v200_v7 }
 0xbdd   :  { %1280 = vtanh.f32 %v945_v56  ;;  %v946_v11 = vmul.f32 %v944_v9, %v1539_v46 }
 0xbdf   :  { %1282 = vtanh.f32 %v946_v11 }
 0xbea   :  { %v1281_v13 = vpop.eup %1280 }
 0xbeb   :  { %v949_v17 = vmul.f32 0.5, %v1281_v13 }
 0xbec   :  { %v1283_v15 = vpop.eup %1282 }
 0xbed   :  { %v950_v19 = vmul.f32 0.5, %v1283_v15  ;;  %v951_v23 = vadd.f32 0.5, %v949_v17 }
 0xbef   :  { %v952_v21 = vadd.f32 0.5, %v950_v19  ;;  %v955_v62 = vmul.f32 %v951_v23, %v859_v51 }
 0xbf1   :  { %v954_v61 = vsel %vm230_vm1, %v1283_v15, %v952_v21 }
 0xbf2   :  { %v956_v25 = vmul.f32 %v954_v61, %v951_v23 }
 0xbf4   :  { %958 = vrot.lane.b32.xlu0 %v956_v25, %s1345_s3 }
 0xc66   :  { %v959_v30 = vpop.permute.xlu0 %958 }
 0xc67   :  { %v961_v31 = vadd.f32 %v959_v30, %v955_v62 }
 0xc69   :  { %1284 = vtanh.f32 %v961_v31 }
 0xc76   :  { %v1285_v32 = vpop.eup %1284 }
 0xc77   :  { %v963_v33 = vmul.f32 %v1285_v32, %v954_v61 }
 0xc79   :  { %970 = vrot.lane.b32.xlu1 %v963_v33, %s1345_s3 }
 0xceb   :  { %v971_v34 = vpop.permute.xlu1 %970 }
 0xcec   :  { %1205 = vmatmul.mubr.msk.f32.vlgmr.msra.gmra.mxu1 %vm256_vm2, %v971_v34 }
 0xdac   :  { %v1040_v38 = vpop.f32.mrf.mxu1 }
 0xdad   :  { %v1045_v41 = vadd.f32 %v1040_v38, %v204_v36 }
 0xdae   :  { %v1042_v42 = vpop.f32.mrf.mxu1 }
 0xdaf   :  { %v1047_v57 = vmul.f32 0.5, %v1045_v41  ;;  %v1046_v43 = vadd.f32 %v1042_v42, %v206_v39 }
 0xdb1   :  { %1286 = vtanh.f32 %v1047_v57  ;;  %v1048_v58 = vmul.f32 %v1046_v43, %v1539_v46  ;;  %v1072_v46 = vld [vmem:[%s1795_s4 + $0x30] sm:$0xff]  ;;  %s1347_s4 = smov [#allocation6]  }
 0xdb2   :  { %1220 = vmatpush3.msra.mxu0 %v1072_v46 }
 0xdb3   :  { %1288 = vtanh.f32 %v1048_v58  ;;  %1221 = vmatprep.subr.mxu0 %v1343_v0 }
 0xdb4   :  { %1222 = vmatpush3.msra.mxu0 %v1071_v37 }
 0xdb5   :  { %1223 = vmatprep.subr.mxu0 %v1343_v0 }
 0xdb6   :  { %1224 = vmatpush3.msra.mxu0 %v1070_v1 }
 0xdb7   :  { %1225 = vmatprep.subr.mxu0 %v1343_v0 }
 0xdb8   :  { %1226 = vmatpush3.msra.mxu0 %v1069_v6 }
 0xdb9   :  { %1227 = vmatprep.subr.mxu0 %v1343_v0 }
 0xdba   :  { %1228 = vmatpush3.msra.mxu0 %v1068_v8 }
 0xdbb   :  { %1229 = vmatprep.subr.mxu0 %v1343_v0 }
 0xdbc   :  { %1230 = vmatpush3.msra.mxu0 %v1067_v10 }
 0xdbd   :  { %1231 = vmatprep.subr.mxu0 %v1343_v0 }
 0xdbe   :  { %v1287_v44 = vpop.eup %1286  ;;  %1232 = vmatpush3.msra.mxu0 %v1066_v12 }
 0xdbf   :  { %v1051_v47 = vmul.f32 0.5, %v1287_v44 }
 0xdc0   :  { %v1289_v45 = vpop.eup %1288 }
 0xdc1   :  { %v1052_v48 = vmul.f32 0.5, %v1289_v45  ;;  %v1053_v4 = vadd.f32 0.5, %v1051_v47 }
 0xdc3   :  { %v1054_v49 = vadd.f32 0.5, %v1052_v48  ;;  %v1057_v14 = vmul.f32 %v1053_v4, %v961_v31 }
 0xdc5   :  { %v1056_v35 = vsel %vm230_vm1, %v1289_v45, %v1054_v49 }
 0xdc6   :  { %v1058_v63 = vmul.f32 %v1056_v35, %v1053_v4 }
 0xdc8   :  { %1060 = vrot.lane.b32.xlu0 %v1058_v63, %s1345_s3 }
 0xe3a   :  { %v1061_v16 = vpop.permute.xlu0 %1060 }
 0xe3b   :  { %v1063_v18 = vadd.f32 %v1061_v16, %v1057_v14 }
 0xe3d   :  { %1290 = vtanh.f32 %v1063_v18 }
 0xe4a   :  { %v1291_v20 = vpop.eup %1290 }
 0xe4b   :  { %v1065_v22 = vmul.f32 %v1291_v20, %v1056_v35 }
 0xe4d   :  { %1082 = vrot.lane.b32.xlu1 %v1065_v22, %s1345_s3  ;;  %s1175_s3 = sshll.u32 %s1347_s4, 4  ;;  %s1176_s3 = int_to_ptr.vmem [resolvable:$true] %s1175_s3 }
 0xe4e   :  { %s1316_s5 = scalar_lea.vmem %s1176_s3, 128  ;;  %p1321_p6 = scmp.lt.s32.totalorder %s1176_s3, %s1176_s3 }
 0xe4f   :  { %p1317_p5 = scmp.ne.s32.totalorder %s1176_s3, %s1316_s5  ;;  %p1322_p7 = scmp.lt.s32.totalorder %s1316_s5, %s1316_s5 }
 0xe51   :  { %p1323_p8 = por %p1322_p7, %p1321_p6 }
 0xe53   :  { %p1324_p9 = pnand %p1323_p8, %p1317_p5 }
 0xebf   :  { %v1083_v24 = vpop.permute.xlu1 %1082 }
 0xec0   :  { %1234 = vmatmul.mubr.msk.f32.vlgmr.msra.gmra.mxu0 %vm256_vm2, %v1083_v24 }
 0xf80   :  { %v1152_v27 = vpop.f32.mrf.mxu0 }
 0xf81   :  { %v1153_v28 = vadd.f32 %v1206_v26, %v1152_v27 }
 0xf82   :  { %v1235_v0 = vpop.f32.mrf.mxu0 }
 0xf83   :  { %v1157_v29 = vsel %vm1156_vm4, %v1153_v28, -inf }
 0xf84   :  { %1158 = vmax.xlane.f32.xlu0 %v1157_v29 }
0x100d   :  { %v1159_v59 = vpop.xlane.xlu0 %1158 }
0x100e   :  { %v1160_v60 = vsub.f32 %v1153_v28, %v1159_v59 }
0x1010   :  { %v1161_v50 = vmul.f32 1.442695, %v1160_v60 }
0x1012   :  { %1292 = vpow2.f32 %v1161_v50 }
0x101f   :  { %v1293_v51 = vpop.eup %1292 }
0x1020   :  { %v1163_v52 = vsel %vm1156_vm4, %v1293_v51, 0.0 }
0x1021   :  { %1164 = vadd.xlane.f32.xlu1 %v1163_v52 }
0x10aa   :  { %v1165_v53 = vpop.xlane.xlu1 %1164 }
0x10ab   :  { %1294 = vrcp.f32 %v1165_v53 }
0x10b8   :  { %v1295_v54 = vpop.eup %1294 }
0x10b9   :  { %v1167_v3 = vmul.f32 %v1295_v54, %v1293_v51 }
0x10bb   :  { %1168 = vst.msk [vmem:[#allocation6] sm:$0xff] %vm1156_vm4, %v1167_v3 }
0x10bc   :  { %1327 = shalt.err (!%p1324_p9)
}
0x10bd   :  { %1178 = dma.vmem_to_hbm [thread:$0]  %s1176_s3, 128, %s1797_s6, [#allocation5]  }
0x10be   :  { %1338 = dma.done.wait [#allocation5], 128  }
0x10bf   :  { %1339 = vsyncadd [#allocation5], 4294967168 }
0x10c0   :  { %1182 = vsyncpa [#allocation4], 1 }
0x10c1   :  { %1183 = vsyncpa [#allocation5], 1 }

</bundles_post_ra>
